<compile_context>
chip_gen: v7x
topology: tpu7x:2x2x1
jax: 0.10.0
libtpu: 0.0.40
codegen_flags: <defaults>
</compile_context>

<pallas_src>
import functools

import jax
import jax.numpy as jnp
from jax import lax
from jax.experimental import pallas as pl
from jax.experimental.pallas import tpu as pltpu

# W_ih^T occupies rows [0, I); W_hh^T starts at this tile-friendly row offset.
_WIH_ROWS = 8


def _encoder_kernel(x_ref, w_ref, aux_ref, out_ref, *, seq_len, input_size):
    """LSTM recurrence + fc head in a single grid-less invocation.

    x_ref:   (B, T*I)    f32  batch-major input (free reshape, no transpose)
    w_ref:   (8+H, 4H)   bf16 rows [0,I) = W_ih^T, rows [8, 8+H) = W_hh^T
    aux_ref: (2+2B, 4H)  f32  row0 = b_ih+b_hh; row1 = [fc_w | fc_b | 0...];
                              rows [2,2+B) = h0; rows [2+B,2+2B) = c0 (lanes [0,H))
    out_ref: (B, 4H)     f32  lanes [0,H) = h_T, lane H = latent
    """
    T, I = seq_len, input_size
    B = x_ref.shape[0]
    H = w_ref.shape[0] - _WIH_ROWS

    # Weights already bf16 (packed at setup); load each sub-block once.
    wih = w_ref[0:I, :]                         # (I, 4H) bf16
    whh = w_ref[_WIH_ROWS:_WIH_ROWS + H, :]     # (H, 4H) bf16

    b = aux_ref[0:1, :]                         # (1, 4H) f32 (b_ih + b_hh)
    wfc = aux_ref[1:2, 0:H]                     # (1, H)  f32 fc weight row
    bfc = aux_ref[1:2, H:H + 1]                 # (1, 1)  f32 fc bias
    h = aux_ref[2:2 + B, 0:H]                   # (B, H)  f32
    c = aux_ref[2 + B:2 + 2 * B, 0:H]           # (B, H)  f32

    # Cast x to bf16 once (one vreg); per-step slices below are static lane slices.
    x_all = x_ref[...].astype(jnp.bfloat16)     # (B, T*I)

    # Serial recurrence: T is a small static constant -> fully unrolled at trace
    # time, giving the LLO scheduler full visibility of the dependence chain.
    for t in range(T):
        x_t = x_all[:, t * I:(t + 1) * I]       # (B, I) bf16, static slice
        # bf16 MXU operands, f32 accumulation; the x-projection dot is
        # independent of h, so it hides under the serial h @ W_hh chain.
        gates = (jnp.dot(x_t, wih, preferred_element_type=jnp.float32)
                 + jnp.dot(h.astype(jnp.bfloat16), whh,
                           preferred_element_type=jnp.float32)
                 + b)                           # (B, 4H) f32
        sig = jax.nn.sigmoid(gates)             # one EUP pass covers i, f, o gates
        tan = jnp.tanh(gates)                   # one EUP pass covers g gate
        i_g = sig[:, 0 * H:1 * H]
        f_g = sig[:, 1 * H:2 * H]
        g_g = tan[:, 2 * H:3 * H]
        o_g = sig[:, 3 * H:4 * H]
        c = f_g * c + i_g * g_g
        h = o_g * jnp.tanh(c)

    # fc head: N=1 output -> VPU multiply + lane reduction (no MXU).
    latent = jnp.sum(h * wfc, axis=-1, keepdims=True) + bfc      # (B, 1)

    # One lane-padded output slab -> single writeback DMA; wrapper splits it.
    out_ref[...] = jnp.zeros_like(out_ref)
    out_ref[:, 0:H] = h.astype(out_ref.dtype)
    out_ref[:, H:H + 1] = latent.astype(out_ref.dtype)


def pack_encoder_params(wih_t, whh_t, b_ih, b_hh, wfc_row, bfc, h0, c0):
    """One-time setup: pack 7 small tensors into 2 VMEM-friendly slabs.

    Collapses per-call input DMAs (fixed DMA issue cost dominates at this size)
    and pre-casts the matmul weights to bf16.
    """
    I, H4 = wih_t.shape
    H = whh_t.shape[0]
    B = h0.shape[0]

    w_all = jnp.zeros((_WIH_ROWS + H, H4), jnp.bfloat16)
    w_all = w_all.at[0:I, :].set(wih_t.astype(jnp.bfloat16))
    w_all = w_all.at[_WIH_ROWS:, :].set(whh_t.astype(jnp.bfloat16))

    aux = jnp.zeros((2 + 2 * B, H4), jnp.float32)
    aux = aux.at[0, :].set((b_ih + b_hh).astype(jnp.float32))
    aux = aux.at[1, 0:H].set(wfc_row[0].astype(jnp.float32))
    aux = aux.at[1, H].set(bfc.reshape(()).astype(jnp.float32))
    aux = aux.at[2:2 + B, 0:H].set(h0.astype(jnp.float32))
    aux = aux.at[2 + B:2 + 2 * B, 0:H].set(c0.astype(jnp.float32))
    return w_all, aux


@jax.jit
def encoder_forward(x, w_all, aux):
    """Returns (lstm_out_last, latent) == PyTorch Encoder.forward's (_, latent)."""
    B, T, I = x.shape
    H4 = w_all.shape[1]
    H = w_all.shape[0] - _WIH_ROWS

    # Contiguous reshape only (bitcast, no transpose / no data movement).
    x2 = x.reshape(B, T * I)

    vmem = pl.BlockSpec(memory_space=pltpu.MemorySpace.VMEM)
    slab = pl.pallas_call(
        functools.partial(_encoder_kernel, seq_len=T, input_size=I),
        out_shape=jax.ShapeDtypeStruct((B, H4), jnp.float32),
        in_specs=[vmem, vmem, vmem],
        out_specs=vmem,
    )(x2, w_all, aux)

    h_T = slab[:, 0:H]
    latent = slab[:, H:H + 1]
    # PyTorch `_` (lstm output of the last single-step call) has shape (1, B, H).
    return h_T[None, :, :], latent


def _reference_forward(x, wih_t, whh_t, b, h0, c0, wfc_row, bfc,
                       matmul_dtype=jnp.float32):
    """Pure-JAX reference. matmul_dtype=bf16 mirrors the kernel's MXU casting."""
    H = whh_t.shape[0]
    wih = wih_t.astype(matmul_dtype)
    whh = whh_t.astype(matmul_dtype)

    def step(carry, x_t):
        h, c = carry
        gates = (jnp.dot(x_t.astype(matmul_dtype), wih,
                         preferred_element_type=jnp.float32)
                 + jnp.dot(h.astype(matmul_dtype), whh,
                           preferred_element_type=jnp.float32)
                 + b)
        i_g = jax.nn.sigmoid(gates[:, 0 * H:1 * H])
        f_g = jax.nn.sigmoid(gates[:, 1 * H:2 * H])
        g_g = jnp.tanh(gates[:, 2 * H:3 * H])
        o_g = jax.nn.sigmoid(gates[:, 3 * H:4 * H])
        c_new = f_g * c + i_g * g_g
        h_new = o_g * jnp.tanh(c_new)
        return (h_new, c_new), h_new

    (h_T, _), _ = lax.scan(step, (h0, c0), jnp.swapaxes(x, 0, 1))
    latent = jnp.sum(h_T * wfc_row, axis=-1, keepdims=True) + bfc
    return h_T[None, :, :], latent


if __name__ == "__main__":
    # Small shapes consistent with the module's config.
    batch = 2
    seq_len = 8
    input_size = 4
    hidden_size = 32          # config['hidden_size_encoder']

    key = jax.random.PRNGKey(0)
    ks = jax.random.split(key, 8)

    bound = 1.0 / jnp.sqrt(hidden_size)
    # Deterministic synthetic parameters (stored pre-transposed for x @ W^T).
    wih_t = jax.random.uniform(ks[0], (input_size, 4 * hidden_size),
                               jnp.float32, -bound, bound)
    whh_t = jax.random.uniform(ks[1], (hidden_size, 4 * hidden_size),
                               jnp.float32, -bound, bound)
    b_ih = jax.random.uniform(ks[2], (4 * hidden_size,), jnp.float32, -bound, bound)
    b_hh = jax.random.uniform(ks[3], (4 * hidden_size,), jnp.float32, -bound, bound)
    wfc_row = jax.random.uniform(ks[4], (1, hidden_size),   # nn.Linear(H, 1).weight
                                 jnp.float32, -bound, bound)
    bfc = jax.random.uniform(ks[5], (1, 1), jnp.float32, -bound, bound)

    # TODO(synk): PyTorch's init_hidden re-draws xavier_normal_ states on every
    # forward call; here deterministic xavier-scaled draws are passed in as inputs.
    xav_std = jnp.sqrt(2.0 / (batch + hidden_size))
    h0 = xav_std * jax.random.normal(ks[6], (batch, hidden_size), jnp.float32)
    c0 = xav_std * jax.random.normal(ks[7], (batch, hidden_size), jnp.float32)

    x = jax.random.normal(jax.random.PRNGKey(42),
                          (batch, seq_len, input_size), jnp.float32)

    # One-time setup: pack params/state -> 2 slabs (3 input DMAs per call).
    w_all, aux = pack_encoder_params(wih_t, whh_t, b_ih, b_hh, wfc_row, bfc, h0, c0)
    w_all, aux = jax.block_until_ready((w_all, aux))

    lstm_out, latent = encoder_forward(x, w_all, aux)
    jax.block_until_ready((lstm_out, latent))

    b_sum = (b_ih + b_hh)[None, :]
    # bf16-matched reference (same MXU operand casting): tight agreement expected.
    ref_out_bf, ref_lat_bf = _reference_forward(
        x, wih_t, whh_t, b_sum, h0, c0, wfc_row, bfc, matmul_dtype=jnp.bfloat16)
    # Full-f32 reference (PyTorch math): loose tolerance for the bf16 MXU cast.
    ref_out_f32, ref_lat_f32 = _reference_forward(
        x, wih_t, whh_t, b_sum, h0, c0, wfc_row, bfc, matmul_dtype=jnp.float32)

    assert lstm_out.shape == (1, batch, hidden_size)
    assert latent.shape == (batch, 1)
    assert jnp.allclose(lstm_out, ref_out_bf, rtol=1e-3, atol=1e-3)
    assert jnp.allclose(latent, ref_lat_bf, rtol=1e-3, atol=1e-3)
    assert jnp.allclose(lstm_out, ref_out_f32, rtol=3e-2, atol=3e-2)
    assert jnp.allclose(latent, ref_lat_f32, rtol=3e-2, atol=3e-2)

    print("KERNEL_OK")
</pallas_src>

<mosaic_0001>
module attributes {stable_mosaic.version = 11 : i64} {
  func.func @_encoder_kernel(%arg0: memref<2x32xf32, #tpu.memory_space<vmem>>, %arg1: memref<40x128xbf16, #tpu.memory_space<vmem>>, %arg2: memref<6x128xf32, #tpu.memory_space<vmem>>, %arg3: memref<2x128xf32, #tpu.memory_space<vmem>>) attributes {dimension_semantics = [], scalar_prefetch = 0 : i64, scratch_operands = 0 : i64, tpu.core_type = #tpu.core_type<tc>} {
    %c0 = arith.constant 0 : index
    %c0_0 = arith.constant 0 : index
    %0 = vector.load %arg1[%c0, %c0_0] : memref<40x128xbf16, #tpu.memory_space<vmem>>, vector<4x128xbf16>
    %c8 = arith.constant 8 : index
    %c0_1 = arith.constant 0 : index
    %1 = vector.load %arg1[%c8, %c0_1] : memref<40x128xbf16, #tpu.memory_space<vmem>>, vector<32x128xbf16>
    %c0_2 = arith.constant 0 : index
    %c0_3 = arith.constant 0 : index
    %2 = vector.load %arg2[%c0_2, %c0_3] : memref<6x128xf32, #tpu.memory_space<vmem>>, vector<1x128xf32>
    %c1 = arith.constant 1 : index
    %c0_4 = arith.constant 0 : index
    %3 = vector.load %arg2[%c1, %c0_4] : memref<6x128xf32, #tpu.memory_space<vmem>>, vector<1x32xf32>
    %c1_5 = arith.constant 1 : index
    %c32 = arith.constant 32 : index
    %4 = vector.load %arg2[%c1_5, %c32] : memref<6x128xf32, #tpu.memory_space<vmem>>, vector<1x1xf32>
    %c2 = arith.constant 2 : index
    %c0_6 = arith.constant 0 : index
    %5 = vector.load %arg2[%c2, %c0_6] : memref<6x128xf32, #tpu.memory_space<vmem>>, vector<2x32xf32>
    %c4 = arith.constant 4 : index
    %c0_7 = arith.constant 0 : index
    %6 = vector.load %arg2[%c4, %c0_7] : memref<6x128xf32, #tpu.memory_space<vmem>>, vector<2x32xf32>
    %c0_8 = arith.constant 0 : index
    %c0_9 = arith.constant 0 : index
    %7 = vector.load %arg0[%c0_8, %c0_9] : memref<2x32xf32, #tpu.memory_space<vmem>>, vector<2x32xf32>
    %8 = arith.truncf %7 : vector<2x32xf32> to vector<2x32xbf16>
    %9 = vector.extract_strided_slice %8 {offsets = [0, 0], sizes = [2, 4], strides = [1, 1]} : vector<2x32xbf16> to vector<2x4xbf16>
    %cst = arith.constant dense<0.000000e+00> : vector<2x128xf32>
    %10 = tpu.matmul %9, %0, %cst {dimension_numbers = #tpu.dot_dimension_numbers<[1], [0], [0], [1], [0, 0, 1, 1], [], []>} : vector<2x4xbf16>, vector<4x128xbf16>, vector<2x128xf32> -> vector<2x128xf32>
    %11 = arith.truncf %5 : vector<2x32xf32> to vector<2x32xbf16>
    %cst_10 = arith.constant dense<0.000000e+00> : vector<2x128xf32>
    %12 = tpu.matmul %11, %1, %cst_10 {dimension_numbers = #tpu.dot_dimension_numbers<[1], [0], [0], [1], [0, 0, 1, 1], [], []>} : vector<2x32xbf16>, vector<32x128xbf16>, vector<2x128xf32> -> vector<2x128xf32>
    %13 = arith.addf %10, %12 : vector<2x128xf32>
    %14 = vector.broadcast %2 : vector<1x128xf32> to vector<2x128xf32>
    %15 = arith.addf %13, %14 : vector<2x128xf32>
    %16 = arith.negf %15 : vector<2x128xf32>
    %17 = math.exp %16 : vector<2x128xf32>
    %cst_11 = arith.constant 1.000000e+00 : f32
    %18 = vector.broadcast %cst_11 : f32 to vector<2x128xf32>
    %19 = arith.addf %18, %17 : vector<2x128xf32>
    %20 = arith.divf %18, %19 : vector<2x128xf32>
    %21 = math.tanh %15 : vector<2x128xf32>
    %22 = vector.extract_strided_slice %20 {offsets = [0, 0], sizes = [2, 32], strides = [1, 1]} : vector<2x128xf32> to vector<2x32xf32>
    %23 = vector.extract_strided_slice %20 {offsets = [0, 32], sizes = [2, 32], strides = [1, 1]} : vector<2x128xf32> to vector<2x32xf32>
    %24 = vector.extract_strided_slice %21 {offsets = [0, 64], sizes = [2, 32], strides = [1, 1]} : vector<2x128xf32> to vector<2x32xf32>
    %25 = vector.extract_strided_slice %20 {offsets = [0, 96], sizes = [2, 32], strides = [1, 1]} : vector<2x128xf32> to vector<2x32xf32>
    %26 = arith.mulf %23, %6 : vector<2x32xf32>
    %27 = arith.mulf %22, %24 : vector<2x32xf32>
    %28 = arith.addf %26, %27 : vector<2x32xf32>
    %29 = math.tanh %28 : vector<2x32xf32>
    %30 = arith.mulf %25, %29 : vector<2x32xf32>
    %31 = vector.extract_strided_slice %8 {offsets = [0, 4], sizes = [2, 4], strides = [1, 1]} : vector<2x32xbf16> to vector<2x4xbf16>
    %cst_12 = arith.constant dense<0.000000e+00> : vector<2x128xf32>
    %32 = tpu.matmul %31, %0, %cst_12 {dimension_numbers = #tpu.dot_dimension_numbers<[1], [0], [0], [1], [0, 0, 1, 1], [], []>} : vector<2x4xbf16>, vector<4x128xbf16>, vector<2x128xf32> -> vector<2x128xf32>
    %33 = arith.truncf %30 : vector<2x32xf32> to vector<2x32xbf16>
    %cst_13 = arith.constant dense<0.000000e+00> : vector<2x128xf32>
    %34 = tpu.matmul %33, %1, %cst_13 {dimension_numbers = #tpu.dot_dimension_numbers<[1], [0], [0], [1], [0, 0, 1, 1], [], []>} : vector<2x32xbf16>, vector<32x128xbf16>, vector<2x128xf32> -> vector<2x128xf32>
    %35 = arith.addf %32, %34 : vector<2x128xf32>
    %36 = vector.broadcast %2 : vector<1x128xf32> to vector<2x128xf32>
    %37 = arith.addf %35, %36 : vector<2x128xf32>
    %38 = arith.negf %37 : vector<2x128xf32>
    %39 = math.exp %38 : vector<2x128xf32>
    %cst_14 = arith.constant 1.000000e+00 : f32
    %40 = vector.broadcast %cst_14 : f32 to vector<2x128xf32>
    %41 = arith.addf %40, %39 : vector<2x128xf32>
    %42 = arith.divf %40, %41 : vector<2x128xf32>
    %43 = math.tanh %37 : vector<2x128xf32>
    %44 = vector.extract_strided_slice %42 {offsets = [0, 0], sizes = [2, 32], strides = [1, 1]} : vector<2x128xf32> to vector<2x32xf32>
    %45 = vector.extract_strided_slice %42 {offsets = [0, 32], sizes = [2, 32], strides = [1, 1]} : vector<2x128xf32> to vector<2x32xf32>
    %46 = vector.extract_strided_slice %43 {offsets = [0, 64], sizes = [2, 32], strides = [1, 1]} : vector<2x128xf32> to vector<2x32xf32>
    %47 = vector.extract_strided_slice %42 {offsets = [0, 96], sizes = [2, 32], strides = [1, 1]} : vector<2x128xf32> to vector<2x32xf32>
    %48 = arith.mulf %45, %28 : vector<2x32xf32>
    %49 = arith.mulf %44, %46 : vector<2x32xf32>
    %50 = arith.addf %48, %49 : vector<2x32xf32>
    %51 = math.tanh %50 : vector<2x32xf32>
    %52 = arith.mulf %47, %51 : vector<2x32xf32>
    %53 = vector.extract_strided_slice %8 {offsets = [0, 8], sizes = [2, 4], strides = [1, 1]} : vector<2x32xbf16> to vector<2x4xbf16>
    %cst_15 = arith.constant dense<0.000000e+00> : vector<2x128xf32>
    %54 = tpu.matmul %53, %0, %cst_15 {dimension_numbers = #tpu.dot_dimension_numbers<[1], [0], [0], [1], [0, 0, 1, 1], [], []>} : vector<2x4xbf16>, vector<4x128xbf16>, vector<2x128xf32> -> vector<2x128xf32>
    %55 = arith.truncf %52 : vector<2x32xf32> to vector<2x32xbf16>
    %cst_16 = arith.constant dense<0.000000e+00> : vector<2x128xf32>
    %56 = tpu.matmul %55, %1, %cst_16 {dimension_numbers = #tpu.dot_dimension_numbers<[1], [0], [0], [1], [0, 0, 1, 1], [], []>} : vector<2x32xbf16>, vector<32x128xbf16>, vector<2x128xf32> -> vector<2x128xf32>
    %57 = arith.addf %54, %56 : vector<2x128xf32>
    %58 = vector.broadcast %2 : vector<1x128xf32> to vector<2x128xf32>
    %59 = arith.addf %57, %58 : vector<2x128xf32>
    %60 = arith.negf %59 : vector<2x128xf32>
    %61 = math.exp %60 : vector<2x128xf32>
    %cst_17 = arith.constant 1.000000e+00 : f32
    %62 = vector.broadcast %cst_17 : f32 to vector<2x128xf32>
    %63 = arith.addf %62, %61 : vector<2x128xf32>
    %64 = arith.divf %62, %63 : vector<2x128xf32>
    %65 = math.tanh %59 : vector<2x128xf32>
    %66 = vector.extract_strided_slice %64 {offsets = [0, 0], sizes = [2, 32], strides = [1, 1]} : vector<2x128xf32> to vector<2x32xf32>
    %67 = vector.extract_strided_slice %64 {offsets = [0, 32], sizes = [2, 32], strides = [1, 1]} : vector<2x128xf32> to vector<2x32xf32>
    %68 = vector.extract_strided_slice %65 {offsets = [0, 64], sizes = [2, 32], strides = [1, 1]} : vector<2x128xf32> to vector<2x32xf32>
    %69 = vector.extract_strided_slice %64 {offsets = [0, 96], sizes = [2, 32], strides = [1, 1]} : vector<2x128xf32> to vector<2x32xf32>
    %70 = arith.mulf %67, %50 : vector<2x32xf32>
    %71 = arith.mulf %66, %68 : vector<2x32xf32>
    %72 = arith.addf %70, %71 : vector<2x32xf32>
    %73 = math.tanh %72 : vector<2x32xf32>
    %74 = arith.mulf %69, %73 : vector<2x32xf32>
    %75 = vector.extract_strided_slice %8 {offsets = [0, 12], sizes = [2, 4], strides = [1, 1]} : vector<2x32xbf16> to vector<2x4xbf16>
    %cst_18 = arith.constant dense<0.000000e+00> : vector<2x128xf32>
    %76 = tpu.matmul %75, %0, %cst_18 {dimension_numbers = #tpu.dot_dimension_numbers<[1], [0], [0], [1], [0, 0, 1, 1], [], []>} : vector<2x4xbf16>, vector<4x128xbf16>, vector<2x128xf32> -> vector<2x128xf32>
    %77 = arith.truncf %74 : vector<2x32xf32> to vector<2x32xbf16>
    %cst_19 = arith.constant dense<0.000000e+00> : vector<2x128xf32>
    %78 = tpu.matmul %77, %1, %cst_19 {dimension_numbers = #tpu.dot_dimension_numbers<[1], [0], [0], [1], [0, 0, 1, 1], [], []>} : vector<2x32xbf16>, vector<32x128xbf16>, vector<2x128xf32> -> vector<2x128xf32>
    %79 = arith.addf %76, %78 : vector<2x128xf32>
    %80 = vector.broadcast %2 : vector<1x128xf32> to vector<2x128xf32>
    %81 = arith.addf %79, %80 : vector<2x128xf32>
    %82 = arith.negf %81 : vector<2x128xf32>
    %83 = math.exp %82 : vector<2x128xf32>
    %cst_20 = arith.constant 1.000000e+00 : f32
    %84 = vector.broadcast %cst_20 : f32 to vector<2x128xf32>
    %85 = arith.addf %84, %83 : vector<2x128xf32>
    %86 = arith.divf %84, %85 : vector<2x128xf32>
    %87 = math.tanh %81 : vector<2x128xf32>
    %88 = vector.extract_strided_slice %86 {offsets = [0, 0], sizes = [2, 32], strides = [1, 1]} : vector<2x128xf32> to vector<2x32xf32>
    %89 = vector.extract_strided_slice %86 {offsets = [0, 32], sizes = [2, 32], strides = [1, 1]} : vector<2x128xf32> to vector<2x32xf32>
    %90 = vector.extract_strided_slice %87 {offsets = [0, 64], sizes = [2, 32], strides = [1, 1]} : vector<2x128xf32> to vector<2x32xf32>
    %91 = vector.extract_strided_slice %86 {offsets = [0, 96], sizes = [2, 32], strides = [1, 1]} : vector<2x128xf32> to vector<2x32xf32>
    %92 = arith.mulf %89, %72 : vector<2x32xf32>
    %93 = arith.mulf %88, %90 : vector<2x32xf32>
    %94 = arith.addf %92, %93 : vector<2x32xf32>
    %95 = math.tanh %94 : vector<2x32xf32>
    %96 = arith.mulf %91, %95 : vector<2x32xf32>
    %97 = vector.extract_strided_slice %8 {offsets = [0, 16], sizes = [2, 4], strides = [1, 1]} : vector<2x32xbf16> to vector<2x4xbf16>
    %cst_21 = arith.constant dense<0.000000e+00> : vector<2x128xf32>
    %98 = tpu.matmul %97, %0, %cst_21 {dimension_numbers = #tpu.dot_dimension_numbers<[1], [0], [0], [1], [0, 0, 1, 1], [], []>} : vector<2x4xbf16>, vector<4x128xbf16>, vector<2x128xf32> -> vector<2x128xf32>
    %99 = arith.truncf %96 : vector<2x32xf32> to vector<2x32xbf16>
    %cst_22 = arith.constant dense<0.000000e+00> : vector<2x128xf32>
    %100 = tpu.matmul %99, %1, %cst_22 {dimension_numbers = #tpu.dot_dimension_numbers<[1], [0], [0], [1], [0, 0, 1, 1], [], []>} : vector<2x32xbf16>, vector<32x128xbf16>, vector<2x128xf32> -> vector<2x128xf32>
    %101 = arith.addf %98, %100 : vector<2x128xf32>
    %102 = vector.broadcast %2 : vector<1x128xf32> to vector<2x128xf32>
    %103 = arith.addf %101, %102 : vector<2x128xf32>
    %104 = arith.negf %103 : vector<2x128xf32>
    %105 = math.exp %104 : vector<2x128xf32>
    %cst_23 = arith.constant 1.000000e+00 : f32
    %106 = vector.broadcast %cst_23 : f32 to vector<2x128xf32>
    %107 = arith.addf %106, %105 : vector<2x128xf32>
    %108 = arith.divf %106, %107 : vector<2x128xf32>
    %109 = math.tanh %103 : vector<2x128xf32>
    %110 = vector.extract_strided_slice %108 {offsets = [0, 0], sizes = [2, 32], strides = [1, 1]} : vector<2x128xf32> to vector<2x32xf32>
    %111 = vector.extract_strided_slice %108 {offsets = [0, 32], sizes = [2, 32], strides = [1, 1]} : vector<2x128xf32> to vector<2x32xf32>
    %112 = vector.extract_strided_slice %109 {offsets = [0, 64], sizes = [2, 32], strides = [1, 1]} : vector<2x128xf32> to vector<2x32xf32>
    %113 = vector.extract_strided_slice %108 {offsets = [0, 96], sizes = [2, 32], strides = [1, 1]} : vector<2x128xf32> to vector<2x32xf32>
    %114 = arith.mulf %111, %94 : vector<2x32xf32>
    %115 = arith.mulf %110, %112 : vector<2x32xf32>
    %116 = arith.addf %114, %115 : vector<2x32xf32>
    %117 = math.tanh %116 : vector<2x32xf32>
    %118 = arith.mulf %113, %117 : vector<2x32xf32>
    %119 = vector.extract_strided_slice %8 {offsets = [0, 20], sizes = [2, 4], strides = [1, 1]} : vector<2x32xbf16> to vector<2x4xbf16>
    %cst_24 = arith.constant dense<0.000000e+00> : vector<2x128xf32>
    %120 = tpu.matmul %119, %0, %cst_24 {dimension_numbers = #tpu.dot_dimension_numbers<[1], [0], [0], [1], [0, 0, 1, 1], [], []>} : vector<2x4xbf16>, vector<4x128xbf16>, vector<2x128xf32> -> vector<2x128xf32>
    %121 = arith.truncf %118 : vector<2x32xf32> to vector<2x32xbf16>
    %cst_25 = arith.constant dense<0.000000e+00> : vector<2x128xf32>
    %122 = tpu.matmul %121, %1, %cst_25 {dimension_numbers = #tpu.dot_dimension_numbers<[1], [0], [0], [1], [0, 0, 1, 1], [], []>} : vector<2x32xbf16>, vector<32x128xbf16>, vector<2x128xf32> -> vector<2x128xf32>
    %123 = arith.addf %120, %122 : vector<2x128xf32>
    %124 = vector.broadcast %2 : vector<1x128xf32> to vector<2x128xf32>
    %125 = arith.addf %123, %124 : vector<2x128xf32>
    %126 = arith.negf %125 : vector<2x128xf32>
    %127 = math.exp %126 : vector<2x128xf32>
    %cst_26 = arith.constant 1.000000e+00 : f32
    %128 = vector.broadcast %cst_26 : f32 to vector<2x128xf32>
    %129 = arith.addf %128, %127 : vector<2x128xf32>
    %130 = arith.divf %128, %129 : vector<2x128xf32>
    %131 = math.tanh %125 : vector<2x128xf32>
    %132 = vector.extract_strided_slice %130 {offsets = [0, 0], sizes = [2, 32], strides = [1, 1]} : vector<2x128xf32> to vector<2x32xf32>
    %133 = vector.extract_strided_slice %130 {offsets = [0, 32], sizes = [2, 32], strides = [1, 1]} : vector<2x128xf32> to vector<2x32xf32>
    %134 = vector.extract_strided_slice %131 {offsets = [0, 64], sizes = [2, 32], strides = [1, 1]} : vector<2x128xf32> to vector<2x32xf32>
    %135 = vector.extract_strided_slice %130 {offsets = [0, 96], sizes = [2, 32], strides = [1, 1]} : vector<2x128xf32> to vector<2x32xf32>
    %136 = arith.mulf %133, %116 : vector<2x32xf32>
    %137 = arith.mulf %132, %134 : vector<2x32xf32>
    %138 = arith.addf %136, %137 : vector<2x32xf32>
    %139 = math.tanh %138 : vector<2x32xf32>
    %140 = arith.mulf %135, %139 : vector<2x32xf32>
    %141 = vector.extract_strided_slice %8 {offsets = [0, 24], sizes = [2, 4], strides = [1, 1]} : vector<2x32xbf16> to vector<2x4xbf16>
    %cst_27 = arith.constant dense<0.000000e+00> : vector<2x128xf32>
    %142 = tpu.matmul %141, %0, %cst_27 {dimension_numbers = #tpu.dot_dimension_numbers<[1], [0], [0], [1], [0, 0, 1, 1], [], []>} : vector<2x4xbf16>, vector<4x128xbf16>, vector<2x128xf32> -> vector<2x128xf32>
    %143 = arith.truncf %140 : vector<2x32xf32> to vector<2x32xbf16>
    %cst_28 = arith.constant dense<0.000000e+00> : vector<2x128xf32>
    %144 = tpu.matmul %143, %1, %cst_28 {dimension_numbers = #tpu.dot_dimension_numbers<[1], [0], [0], [1], [0, 0, 1, 1], [], []>} : vector<2x32xbf16>, vector<32x128xbf16>, vector<2x128xf32> -> vector<2x128xf32>
    %145 = arith.addf %142, %144 : vector<2x128xf32>
    %146 = vector.broadcast %2 : vector<1x128xf32> to vector<2x128xf32>
    %147 = arith.addf %145, %146 : vector<2x128xf32>
    %148 = arith.negf %147 : vector<2x128xf32>
    %149 = math.exp %148 : vector<2x128xf32>
    %cst_29 = arith.constant 1.000000e+00 : f32
    %150 = vector.broadcast %cst_29 : f32 to vector<2x128xf32>
    %151 = arith.addf %150, %149 : vector<2x128xf32>
    %152 = arith.divf %150, %151 : vector<2x128xf32>
    %153 = math.tanh %147 : vector<2x128xf32>
    %154 = vector.extract_strided_slice %152 {offsets = [0, 0], sizes = [2, 32], strides = [1, 1]} : vector<2x128xf32> to vector<2x32xf32>
    %155 = vector.extract_strided_slice %152 {offsets = [0, 32], sizes = [2, 32], strides = [1, 1]} : vector<2x128xf32> to vector<2x32xf32>
    %156 = vector.extract_strided_slice %153 {offsets = [0, 64], sizes = [2, 32], strides = [1, 1]} : vector<2x128xf32> to vector<2x32xf32>
    %157 = vector.extract_strided_slice %152 {offsets = [0, 96], sizes = [2, 32], strides = [1, 1]} : vector<2x128xf32> to vector<2x32xf32>
    %158 = arith.mulf %155, %138 : vector<2x32xf32>
    %159 = arith.mulf %154, %156 : vector<2x32xf32>
    %160 = arith.addf %158, %159 : vector<2x32xf32>
    %161 = math.tanh %160 : vector<2x32xf32>
    %162 = arith.mulf %157, %161 : vector<2x32xf32>
    %163 = vector.extract_strided_slice %8 {offsets = [0, 28], sizes = [2, 4], strides = [1, 1]} : vector<2x32xbf16> to vector<2x4xbf16>
    %cst_30 = arith.constant dense<0.000000e+00> : vector<2x128xf32>
    %164 = tpu.matmul %163, %0, %cst_30 {dimension_numbers = #tpu.dot_dimension_numbers<[1], [0], [0], [1], [0, 0, 1, 1], [], []>} : vector<2x4xbf16>, vector<4x128xbf16>, vector<2x128xf32> -> vector<2x128xf32>
    %165 = arith.truncf %162 : vector<2x32xf32> to vector<2x32xbf16>
    %cst_31 = arith.constant dense<0.000000e+00> : vector<2x128xf32>
    %166 = tpu.matmul %165, %1, %cst_31 {dimension_numbers = #tpu.dot_dimension_numbers<[1], [0], [0], [1], [0, 0, 1, 1], [], []>} : vector<2x32xbf16>, vector<32x128xbf16>, vector<2x128xf32> -> vector<2x128xf32>
    %167 = arith.addf %164, %166 : vector<2x128xf32>
    %168 = vector.broadcast %2 : vector<1x128xf32> to vector<2x128xf32>
    %169 = arith.addf %167, %168 : vector<2x128xf32>
    %170 = arith.negf %169 : vector<2x128xf32>
    %171 = math.exp %170 : vector<2x128xf32>
    %cst_32 = arith.constant 1.000000e+00 : f32
    %172 = vector.broadcast %cst_32 : f32 to vector<2x128xf32>
    %173 = arith.addf %172, %171 : vector<2x128xf32>
    %174 = arith.divf %172, %173 : vector<2x128xf32>
    %175 = math.tanh %169 : vector<2x128xf32>
    %176 = vector.extract_strided_slice %174 {offsets = [0, 0], sizes = [2, 32], strides = [1, 1]} : vector<2x128xf32> to vector<2x32xf32>
    %177 = vector.extract_strided_slice %174 {offsets = [0, 32], sizes = [2, 32], strides = [1, 1]} : vector<2x128xf32> to vector<2x32xf32>
    %178 = vector.extract_strided_slice %175 {offsets = [0, 64], sizes = [2, 32], strides = [1, 1]} : vector<2x128xf32> to vector<2x32xf32>
    %179 = vector.extract_strided_slice %174 {offsets = [0, 96], sizes = [2, 32], strides = [1, 1]} : vector<2x128xf32> to vector<2x32xf32>
    %180 = arith.mulf %177, %160 : vector<2x32xf32>
    %181 = arith.mulf %176, %178 : vector<2x32xf32>
    %182 = arith.addf %180, %181 : vector<2x32xf32>
    %183 = math.tanh %182 : vector<2x32xf32>
    %184 = arith.mulf %179, %183 : vector<2x32xf32>
    %185 = vector.broadcast %3 : vector<1x32xf32> to vector<2x32xf32>
    %186 = arith.mulf %184, %185 : vector<2x32xf32>
    %cst_33 = arith.constant dense<0.000000e+00> : vector<2xf32>
    %187 = vector.multi_reduction <add>, %186, %cst_33 [1] : vector<2x32xf32> to vector<2xf32>
    %188 = vector.shape_cast %187 : vector<2xf32> to vector<2x1xf32>
    %189 = vector.broadcast %4 : vector<1x1xf32> to vector<2x1xf32>
    %190 = arith.addf %188, %189 : vector<2x1xf32>
    %cst_34 = arith.constant 0.000000e+00 : f32
    %191 = vector.broadcast %cst_34 : f32 to vector<2x128xf32>
    %c0_35 = arith.constant 0 : index
    %c0_36 = arith.constant 0 : index
    %192 = vector.load %arg3[%c0_35, %c0_36] : memref<2x128xf32, #tpu.memory_space<vmem>>, vector<2x128xf32>
    tpu.vector_store %arg3[%c0_35, %c0_36], %191 {strides = array<i32>} : memref<2x128xf32, #tpu.memory_space<vmem>>, vector<2x128xf32>,
    %c0_37 = arith.constant 0 : index
    %c0_38 = arith.constant 0 : index
    %193 = vector.load %arg3[%c0_37, %c0_38] : memref<2x128xf32, #tpu.memory_space<vmem>>, vector<2x32xf32>
    tpu.vector_store %arg3[%c0_37, %c0_38], %184 {strides = array<i32>} : memref<2x128xf32, #tpu.memory_space<vmem>>, vector<2x32xf32>,
    %c0_39 = arith.constant 0 : index
    %c32_40 = arith.constant 32 : index
    %194 = vector.load %arg3[%c0_39, %c32_40] : memref<2x128xf32, #tpu.memory_space<vmem>>, vector<2x1xf32>
    tpu.vector_store %arg3[%c0_39, %c32_40], %190 {strides = array<i32>} : memref<2x128xf32, #tpu.memory_space<vmem>>, vector<2x1xf32>,
    return
  }
}

</mosaic_0001>

<bundles_post_ra>
// kernel: encoder_forward.1
= control target key start
LH: loop header
LB: loop body
LE: loop exit
PB: predicated region body
PF: predicated region fallthrough
CT: control target
= control target key end

     0   :  { %vm87_vm0 = vcmask 1041408   ;;  %v1272_v0 = vmov 0.0   ;;  %vm1273_vm1 = vmmov 0   ;;  %vm83_vm2 = vcmask 31744   ;;  %s1274_s22 = smov 64   ;;  %s1275_s25 = smov 32   ;;  %s1494_s1 = inlined_call_operand.vmem [shape: bf16[40,128], index: 1, kind: input, shape index: {}]   ;;  %s1495_s0 = inlined_call_operand.vmem [shape: f32[2,32], index: 0, kind: input, shape index: {}]   ;;  %s1496_s2 = inlined_call_operand.vmem [shape: f32[6,128], index: 2, kind: input, shape index: {}]   ;;  %s1497_s3 = inlined_call_operand.vmem [shape: f32[2,128], index: 3, kind: output, shape index: {}]  }
   0x1   :  { %1082 = vmatprep.subr.bf16.mxu0 %v1272_v0  ;;  %v1308_v1 = vld [vmem:[%s1494_s1 + $0x4] sm:$0xff]   ;;  %1090 = vmatprep.subr.bf16.mxu1 %v1272_v0  ;;  %v15_v2 = vld [vmem:[%s1494_s1] sm:$0x3]  ;;  %v1324_v4 = vld [vmem:[%s1494_s1 + $0xc] sm:$0xff]   ;;  %vm39_vm3 = vcmask 261120   ;;  %s1276_s26 = smov 124  }
   0x2   :  { %1092 = vmatprep.mubr.msk.bf16.mxu1 %vm1273_vm1, %v1272_v0  ;;  %1086 = vmatprep.mubr.msk.bf16.mxu0 %vm1273_vm1, %v1272_v0  ;;  %v1319_v3 = vsel %vm87_vm0, %v15_v2, 0  ;;  %v24_v5 = vld [vmem:[%s1495_s0] sm:$0x3]  ;;  %v22_v7 = vld [vmem:[%s1496_s2 + $0x2] sm:$0x3]  ;;  %s1277_s27 = smov 120  }
   0x3   :  { %1083 = vmatpush3.bf16.msra.mxu0 %v1308_v1  ;;  %1091 = vmatpush3.bf16.msra.mxu1 %v1319_v3  ;;  %v1331_v6 = vpack.c.bf16 %v24_v5, %v24_v5  ;;  %v26_v8 = vpack.c.bf16 %v22_v7, %v22_v7  ;;  %v1355_v12 = vld [vmem:[%s1496_s2] ss:$0 sm:$0xff]  ;;  %v23_v21 = vld [vmem:[%s1496_s2 + $0x4] sm:$0x3]  ;;  %s1278_s28 = smov 116   ;;  %s1279_s29 = smov 112  }
   0x4   :  { %1084 = vmatprep.subr.bf16.mxu0 %v1272_v0  ;;  %1096 = vmatprep.subr.bf16.mxu1 %v1272_v0  ;;  %s1280_s30 = smov 108   ;;  %s1281_s4 = smov 104   ;;  %1002 = vst [vmem:[%s1497_s3] sm:$0x3] %v1272_v0  ;;  %vm997_vm4 = vcmask 254976   ;;  %vm1008_vm5 = vcmask 263424  }
   0x5   :  { %s1282_s5 = smov 100   ;;  %s1283_s8 = smov 96  }
   0x6   :  { %1093 = vmatmul.mubr.msk.bf16.vlgmr.msra.gmra.mrb[0].mxu1 %vm83_vm2, %v1331_v6 }
   0x7   :  { %1085 = vmatpush3.bf16.msra.mxu0 %v1324_v4  ;;  %1097 = vmatpush3.bf16.msra.mxu1 %v1308_v1 }
   0x8   :  { %1104 = vmatprep.subr.bf16.mxu0 %v1272_v0  ;;  %1098 = vmatprep.subr.bf16.mxu1 %v1272_v0 }
   0x9   :  { %1100 = vmatprep.mubr.msk.bf16.mxu1 %vm1273_vm1, %v1272_v0 }
   0xa   :  { %1087 = vmatmul.mubr.msk.bf16.vlgmr.msra.gmra.mrb[0].mxu0 %vm39_vm3, %v26_v8 }
   0xb   :  { %1105 = vmatpush3.bf16.msra.mxu0 %v1319_v3  ;;  %1106 = vmatprep.mubr.msk.bf16.mxu0 %vm1273_vm1, %v1272_v0 }
   0xc   :  { %1099 = vmatpush3.bf16.msra.mxu1 %v1324_v4  ;;  %1118 = vmatprep.subr.bf16.mxu0 %v1272_v0 }
   0xd   :  { %1110 = vmatprep.subr.bf16.mxu1 %v1272_v0 }
  0xd9   :  { %v125_v9 = vpop.f32.mrb[0].mxu1 }
  0xda   :  { %v1094_v10 = vpop.f32.mrb[1].mxu1 }
  0xdb   :  { %v128_v11 = vpop.f32.mrb[2].mxu1 }
  0xdc   :  { %v1095_v14 = vpop.f32.mrb[3].mxu1 }
  0xdd   :  { %v77_v13 = vpop.f32.mrb[0].mxu0 }
  0xde   :  { %v126_v15 = vadd.f32 %v125_v9, %v77_v13  ;;  %v1088_v16 = vpop.f32.mrb[1].mxu0 }
  0xdf   :  { %v80_v17 = vpop.f32.mrb[2].mxu0 }
  0xe0   :  { %v135_v18 = vadd.f32 %v1355_v12, %v126_v15  ;;  %v1089_v19 = vpop.f32.mrb[3].mxu0 }
  0xe2   :  { %1208 = vtanh.f32 %v135_v18  ;;  %v1019_v22 = vmul.f32 -1.442695, %v135_v18 }
  0xe4   :  { %1210 = vpow2.f32 %v1019_v22 }
  0xec   :  { %v1209_v20 = vpop.eup %1208 }
  0xed   :  { %149 = vrot.lane.b32.xlu0 %v1209_v20, %s1274_s22 }
  0xee   :  { %v1211_v23 = vpop.eup %1210 }
  0xef   :  { %v139_v24 = vadd.f32 1.0, %v1211_v23 }
  0xf1   :  { %144 = vrot.lane.b32.xlu0 %v23_v21, %s1275_s25  ;;  %1212 = vrcp.f32 %v139_v24 }
  0xfb   :  { %v1213_v25 = vpop.eup %1212 }
 0x15f   :  { %v150_v26 = vpop.permute.xlu0 %149 }
 0x160   :  { %v152_v27 = vmul.f32 %v1213_v25, %v150_v26 }
 0x162   :  { %154 = vrot.lane.b32.xlu1 %v152_v27, %s1275_s25 }
 0x163   :  { %v145_v28 = vpop.permute.xlu0 %144 }
 0x164   :  { %v147_v29 = vmul.f32 %v1213_v25, %v145_v28 }
 0x1d4   :  { %v155_v30 = vpop.permute.xlu1 %154 }
 0x1d5   :  { %v157_v31 = vadd.f32 %v155_v30, %v147_v29 }
 0x1d7   :  { %1214 = vtanh.f32 %v157_v31 }
 0x1e1   :  { %v1215_v32 = vpop.eup %1214 }
 0x1e2   :  { %160 = vrot.lane.b32.xlu1 %v1215_v32, %s1274_s22 }
 0x1e6   :  { %212 = vrot.lane.b32.xlu1 %v1331_v6, %s1276_s26 }
 0x254   :  { %v161_v33 = vpop.permute.xlu1 %160 }
 0x255   :  { %v163_v34 = vmul.f32 %v1213_v25, %v161_v33 }
 0x257   :  { %v164_v35 = vpack.c.bf16 %v163_v34, %v163_v34 }
 0x258   :  { %v213_v36 = vpop.permute.xlu1 %212 }
 0x259   :  { %166 = vrot.lane.b32.xlu0 %v164_v35, %s1275_s25  ;;  %1107 = vmatmul.mubr.msk.bf16.vlgmr.msra.gmra.mrb[4].mxu0 %vm83_vm2, %v213_v36 }
 0x25a   :  { %1119 = vmatpush3.bf16.msra.mxu0 %v1319_v3  ;;  %1120 = vmatprep.mubr.msk.bf16.mxu0 %vm1273_vm1, %v1272_v0 }
 0x25b   :  { %1132 = vmatprep.subr.bf16.mxu0 %v1272_v0 }
 0x2cb   :  { %v167_v37 = vpop.permute.xlu0 %166 }
 0x2cc   :  { %1101 = vmatmul.mubr.msk.bf16.vlgmr.msra.gmra.mrb[4].mxu1 %vm39_vm3, %v167_v37 }
 0x2cd   :  { %1111 = vmatpush3.bf16.msra.mxu1 %v1308_v1  ;;  %1114 = vmatprep.mubr.msk.bf16.mxu1 %vm1273_vm1, %v1272_v0 }
 0x2ce   :  { %1112 = vmatprep.subr.bf16.mxu1 %v1272_v0 }
 0x2d1   :  { %1113 = vmatpush3.bf16.msra.mxu1 %v1324_v4 }
 0x2d2   :  { %1124 = vmatprep.subr.bf16.mxu1 %v1272_v0 }
 0x32c   :  { %v251_v38 = vpop.f32.mrb[4].mxu0 }
 0x32d   :  { %v1108_v39 = vpop.f32.mrb[5].mxu0 }
 0x32e   :  { %v254_v40 = vpop.f32.mrb[6].mxu0 }
 0x32f   :  { %v1109_v41 = vpop.f32.mrb[7].mxu0 }
 0x39f   :  { %v205_v42 = vpop.f32.mrb[4].mxu1 }
 0x3a0   :  { %v252_v43 = vadd.f32 %v251_v38, %v205_v42  ;;  %v1102_v44 = vpop.f32.mrb[5].mxu1 }
 0x3a1   :  { %v208_v45 = vpop.f32.mrb[6].mxu1 }
 0x3a2   :  { %v257_v46 = vadd.f32 %v1355_v12, %v252_v43  ;;  %v1103_v47 = vpop.f32.mrb[7].mxu1 }
 0x3a4   :  { %1216 = vtanh.f32 %v257_v46  ;;  %v1022_v49 = vmul.f32 -1.442695, %v257_v46 }
 0x3a6   :  { %1218 = vpow2.f32 %v1022_v49 }
 0x3ae   :  { %v1217_v48 = vpop.eup %1216 }
 0x3af   :  { %267 = vrot.lane.b32.xlu0 %v1217_v48, %s1274_s22 }
 0x3b0   :  { %v1219_v50 = vpop.eup %1218 }
 0x3b1   :  { %v261_v51 = vadd.f32 1.0, %v1219_v50 }
 0x3b3   :  { %1220 = vrcp.f32 %v261_v51 }
 0x3bd   :  { %v1221_v52 = vpop.eup %1220 }
 0x3be   :  { %v265_v55 = vmul.f32 %v1221_v52, %v157_v31 }
 0x421   :  { %v268_v53 = vpop.permute.xlu0 %267 }
 0x422   :  { %v270_v54 = vmul.f32 %v1221_v52, %v268_v53 }
 0x424   :  { %272 = vrot.lane.b32.xlu1 %v270_v54, %s1275_s25 }
 0x496   :  { %v273_v56 = vpop.permute.xlu1 %272 }
 0x497   :  { %v275_v57 = vadd.f32 %v273_v56, %v265_v55 }
 0x499   :  { %1222 = vtanh.f32 %v275_v57 }
 0x4a3   :  { %v1223_v58 = vpop.eup %1222 }
 0x4a4   :  { %278 = vrot.lane.b32.xlu0 %v1223_v58, %s1274_s22 }
 0x4a8   :  { %329 = vrot.lane.b32.xlu0 %v1331_v6, %s1277_s27 }
 0x516   :  { %v279_v59 = vpop.permute.xlu0 %278 }
 0x517   :  { %v281_v60 = vmul.f32 %v1221_v52, %v279_v59 }
 0x519   :  { %v282_v61 = vpack.c.bf16 %v281_v60, %v281_v60 }
 0x51a   :  { %v330_v62 = vpop.permute.xlu0 %329 }
 0x51b   :  { %284 = vrot.lane.b32.xlu1 %v282_v61, %s1275_s25  ;;  %1121 = vmatmul.mubr.msk.bf16.vlgmr.msra.gmra.mrb[8].mxu0 %vm83_vm2, %v330_v62 }
 0x51c   :  { %1133 = vmatpush3.bf16.msra.mxu0 %v1319_v3  ;;  %1134 = vmatprep.mubr.msk.bf16.mxu0 %vm1273_vm1, %v1272_v0 }
 0x51d   :  { %1146 = vmatprep.subr.bf16.mxu0 %v1272_v0 }
 0x58d   :  { %v285_v63 = vpop.permute.xlu1 %284 }
 0x58e   :  { %1115 = vmatmul.mubr.msk.bf16.vlgmr.msra.gmra.mrb[8].mxu1 %vm39_vm3, %v285_v63 }
 0x58f   :  { %1125 = vmatpush3.bf16.msra.mxu1 %v1308_v1  ;;  %1128 = vmatprep.mubr.msk.bf16.mxu1 %vm1273_vm1, %v1272_v0 }
 0x590   :  { %1126 = vmatprep.subr.bf16.mxu1 %v1272_v0 }
 0x593   :  { %1127 = vmatpush3.bf16.msra.mxu1 %v1324_v4 }
 0x594   :  { %1138 = vmatprep.subr.bf16.mxu1 %v1272_v0 }
 0x5ee   :  { %v368_v2 = vpop.f32.mrb[8].mxu0 }
 0x5ef   :  { %v1122_v5 = vpop.f32.mrb[9].mxu0 }
 0x5f0   :  { %v371_v7 = vpop.f32.mrb[10].mxu0 }
 0x5f1   :  { %v1123_v8 = vpop.f32.mrb[11].mxu0 }
 0x661   :  { %v323_v9 = vpop.f32.mrb[8].mxu1 }
 0x662   :  { %v369_v10 = vadd.f32 %v368_v2, %v323_v9  ;;  %v1116_v11 = vpop.f32.mrb[9].mxu1 }
 0x663   :  { %v326_v13 = vpop.f32.mrb[10].mxu1 }
 0x664   :  { %v374_v14 = vadd.f32 %v1355_v12, %v369_v10  ;;  %v1117_v15 = vpop.f32.mrb[11].mxu1 }
 0x666   :  { %1224 = vtanh.f32 %v374_v14  ;;  %v1025_v17 = vmul.f32 -1.442695, %v374_v14 }
 0x668   :  { %1226 = vpow2.f32 %v1025_v17 }
 0x670   :  { %v1225_v16 = vpop.eup %1224 }
 0x671   :  { %384 = vrot.lane.b32.xlu1 %v1225_v16, %s1274_s22 }
 0x672   :  { %v1227_v18 = vpop.eup %1226 }
 0x673   :  { %v378_v19 = vadd.f32 1.0, %v1227_v18 }
 0x675   :  { %1228 = vrcp.f32 %v378_v19 }
 0x67f   :  { %v1229_v20 = vpop.eup %1228 }
 0x680   :  { %v382_v23 = vmul.f32 %v1229_v20, %v275_v57 }
 0x6e3   :  { %v385_v21 = vpop.permute.xlu1 %384 }
 0x6e4   :  { %v387_v22 = vmul.f32 %v1229_v20, %v385_v21 }
 0x6e6   :  { %389 = vrot.lane.b32.xlu0 %v387_v22, %s1275_s25 }
 0x758   :  { %v390_v24 = vpop.permute.xlu0 %389 }
 0x759   :  { %v392_v25 = vadd.f32 %v390_v24, %v382_v23 }
 0x75b   :  { %1230 = vtanh.f32 %v392_v25 }
 0x765   :  { %v1231_v26 = vpop.eup %1230 }
 0x766   :  { %395 = vrot.lane.b32.xlu1 %v1231_v26, %s1274_s22 }
 0x76a   :  { %446 = vrot.lane.b32.xlu1 %v1331_v6, %s1278_s28 }
 0x7d8   :  { %v396_v27 = vpop.permute.xlu1 %395 }
 0x7d9   :  { %v398_v28 = vmul.f32 %v1229_v20, %v396_v27 }
 0x7db   :  { %v399_v29 = vpack.c.bf16 %v398_v28, %v398_v28 }
 0x7dc   :  { %v447_v30 = vpop.permute.xlu1 %446 }
 0x7dd   :  { %401 = vrot.lane.b32.xlu0 %v399_v29, %s1275_s25  ;;  %1135 = vmatmul.mubr.msk.bf16.vlgmr.msra.gmra.mrb[12].mxu0 %vm83_vm2, %v447_v30 }
 0x7de   :  { %1147 = vmatpush3.bf16.msra.mxu0 %v1319_v3  ;;  %1148 = vmatprep.mubr.msk.bf16.mxu0 %vm1273_vm1, %v1272_v0 }
 0x7df   :  { %1160 = vmatprep.subr.bf16.mxu0 %v1272_v0 }
 0x84f   :  { %v402_v31 = vpop.permute.xlu0 %401 }
 0x850   :  { %1129 = vmatmul.mubr.msk.bf16.vlgmr.msra.gmra.mrb[12].mxu1 %vm39_vm3, %v402_v31 }
 0x851   :  { %1139 = vmatpush3.bf16.msra.mxu1 %v1308_v1  ;;  %1142 = vmatprep.mubr.msk.bf16.mxu1 %vm1273_vm1, %v1272_v0 }
 0x852   :  { %1140 = vmatprep.subr.bf16.mxu1 %v1272_v0 }
 0x855   :  { %1141 = vmatpush3.bf16.msra.mxu1 %v1324_v4 }
 0x856   :  { %1152 = vmatprep.subr.bf16.mxu1 %v1272_v0 }
 0x8b0   :  { %v485_v32 = vpop.f32.mrb[12].mxu0 }
 0x8b1   :  { %v1136_v33 = vpop.f32.mrb[13].mxu0 }
 0x8b2   :  { %v488_v34 = vpop.f32.mrb[14].mxu0 }
 0x8b3   :  { %v1137_v35 = vpop.f32.mrb[15].mxu0 }
 0x923   :  { %v440_v36 = vpop.f32.mrb[12].mxu1 }
 0x924   :  { %v486_v37 = vadd.f32 %v485_v32, %v440_v36  ;;  %v1130_v38 = vpop.f32.mrb[13].mxu1 }
 0x925   :  { %v443_v39 = vpop.f32.mrb[14].mxu1 }
 0x926   :  { %v491_v40 = vadd.f32 %v1355_v12, %v486_v37  ;;  %v1131_v41 = vpop.f32.mrb[15].mxu1 }
 0x928   :  { %1232 = vtanh.f32 %v491_v40  ;;  %v1028_v43 = vmul.f32 -1.442695, %v491_v40 }
 0x92a   :  { %1234 = vpow2.f32 %v1028_v43 }
 0x932   :  { %v1233_v42 = vpop.eup %1232 }
 0x933   :  { %501 = vrot.lane.b32.xlu0 %v1233_v42, %s1274_s22 }
 0x934   :  { %v1235_v44 = vpop.eup %1234 }
 0x935   :  { %v495_v45 = vadd.f32 1.0, %v1235_v44 }
 0x937   :  { %1236 = vrcp.f32 %v495_v45 }
 0x941   :  { %v1237_v46 = vpop.eup %1236 }
 0x942   :  { %v499_v49 = vmul.f32 %v1237_v46, %v392_v25 }
 0x9a5   :  { %v502_v47 = vpop.permute.xlu0 %501 }
 0x9a6   :  { %v504_v48 = vmul.f32 %v1237_v46, %v502_v47 }
 0x9a8   :  { %506 = vrot.lane.b32.xlu1 %v504_v48, %s1275_s25 }
 0xa1a   :  { %v507_v50 = vpop.permute.xlu1 %506 }
 0xa1b   :  { %v509_v51 = vadd.f32 %v507_v50, %v499_v49 }
 0xa1d   :  { %1238 = vtanh.f32 %v509_v51 }
 0xa27   :  { %v1239_v52 = vpop.eup %1238 }
 0xa28   :  { %512 = vrot.lane.b32.xlu0 %v1239_v52, %s1274_s22 }
 0xa2c   :  { %563 = vrot.lane.b32.xlu0 %v1331_v6, %s1279_s29 }
 0xa9a   :  { %v513_v53 = vpop.permute.xlu0 %512 }
 0xa9b   :  { %v515_v54 = vmul.f32 %v1237_v46, %v513_v53 }
 0xa9d   :  { %v516_v55 = vpack.c.bf16 %v515_v54, %v515_v54 }
 0xa9e   :  { %v564_v56 = vpop.permute.xlu0 %563 }
 0xa9f   :  { %518 = vrot.lane.b32.xlu1 %v516_v55, %s1275_s25  ;;  %1149 = vmatmul.mubr.msk.bf16.vlgmr.msra.gmra.mrb[16].mxu0 %vm83_vm2, %v564_v56 }
 0xaa0   :  { %1161 = vmatpush3.bf16.msra.mxu0 %v1319_v3  ;;  %1162 = vmatprep.mubr.msk.bf16.mxu0 %vm1273_vm1, %v1272_v0 }
 0xaa1   :  { %1174 = vmatprep.subr.bf16.mxu0 %v1272_v0 }
 0xb11   :  { %v519_v57 = vpop.permute.xlu1 %518 }
 0xb12   :  { %1143 = vmatmul.mubr.msk.bf16.vlgmr.msra.gmra.mrb[16].mxu1 %vm39_vm3, %v519_v57 }
 0xb13   :  { %1153 = vmatpush3.bf16.msra.mxu1 %v1308_v1  ;;  %1156 = vmatprep.mubr.msk.bf16.mxu1 %vm1273_vm1, %v1272_v0 }
 0xb14   :  { %1154 = vmatprep.subr.bf16.mxu1 %v1272_v0 }
 0xb17   :  { %1155 = vmatpush3.bf16.msra.mxu1 %v1324_v4 }
 0xb18   :  { %1166 = vmatprep.subr.bf16.mxu1 %v1272_v0 }
 0xb72   :  { %v602_v58 = vpop.f32.mrb[16].mxu0 }
 0xb73   :  { %v1150_v59 = vpop.f32.mrb[17].mxu0 }
 0xb74   :  { %v605_v60 = vpop.f32.mrb[18].mxu0 }
 0xb75   :  { %v1151_v61 = vpop.f32.mrb[19].mxu0 }
 0xbe5   :  { %v557_v62 = vpop.f32.mrb[16].mxu1 }
 0xbe6   :  { %v603_v63 = vadd.f32 %v602_v58, %v557_v62  ;;  %v1144_v2 = vpop.f32.mrb[17].mxu1 }
 0xbe7   :  { %v560_v5 = vpop.f32.mrb[18].mxu1 }
 0xbe8   :  { %v608_v7 = vadd.f32 %v1355_v12, %v603_v63  ;;  %v1145_v8 = vpop.f32.mrb[19].mxu1 }
 0xbea   :  { %1240 = vtanh.f32 %v608_v7  ;;  %v1031_v10 = vmul.f32 -1.442695, %v608_v7 }
 0xbec   :  { %1242 = vpow2.f32 %v1031_v10 }
 0xbf4   :  { %v1241_v9 = vpop.eup %1240 }
 0xbf5   :  { %618 = vrot.lane.b32.xlu1 %v1241_v9, %s1274_s22 }
 0xbf6   :  { %v1243_v11 = vpop.eup %1242 }
 0xbf7   :  { %v612_v13 = vadd.f32 1.0, %v1243_v11 }
 0xbf9   :  { %1244 = vrcp.f32 %v612_v13 }
 0xc03   :  { %v1245_v14 = vpop.eup %1244 }
 0xc04   :  { %v616_v17 = vmul.f32 %v1245_v14, %v509_v51 }
 0xc67   :  { %v619_v15 = vpop.permute.xlu1 %618 }
 0xc68   :  { %v621_v16 = vmul.f32 %v1245_v14, %v619_v15 }
 0xc6a   :  { %623 = vrot.lane.b32.xlu0 %v621_v16, %s1275_s25 }
 0xcdc   :  { %v624_v18 = vpop.permute.xlu0 %623 }
 0xcdd   :  { %v626_v19 = vadd.f32 %v624_v18, %v616_v17 }
 0xcdf   :  { %1246 = vtanh.f32 %v626_v19 }
 0xce9   :  { %v1247_v20 = vpop.eup %1246 }
 0xcea   :  { %629 = vrot.lane.b32.xlu1 %v1247_v20, %s1274_s22 }
 0xcee   :  { %680 = vrot.lane.b32.xlu1 %v1331_v6, %s1280_s30 }
 0xd5c   :  { %v630_v21 = vpop.permute.xlu1 %629 }
 0xd5d   :  { %v632_v22 = vmul.f32 %v1245_v14, %v630_v21 }
 0xd5f   :  { %v633_v23 = vpack.c.bf16 %v632_v22, %v632_v22 }
 0xd60   :  { %v681_v24 = vpop.permute.xlu1 %680 }
 0xd61   :  { %635 = vrot.lane.b32.xlu0 %v633_v23, %s1275_s25  ;;  %1163 = vmatmul.mubr.msk.bf16.vlgmr.msra.gmra.mrb[20].mxu0 %vm83_vm2, %v681_v24 }
 0xd62   :  { %1175 = vmatpush3.bf16.msra.mxu0 %v1319_v3  ;;  %1176 = vmatprep.mubr.msk.bf16.mxu0 %vm1273_vm1, %v1272_v0 }
 0xd63   :  { %1188 = vmatprep.subr.bf16.mxu0 %v1272_v0 }
 0xdd3   :  { %v636_v25 = vpop.permute.xlu0 %635 }
 0xdd4   :  { %1157 = vmatmul.mubr.msk.bf16.vlgmr.msra.gmra.mrb[20].mxu1 %vm39_vm3, %v636_v25 }
 0xdd5   :  { %1167 = vmatpush3.bf16.msra.mxu1 %v1308_v1  ;;  %1170 = vmatprep.mubr.msk.bf16.mxu1 %vm1273_vm1, %v1272_v0 }
 0xdd6   :  { %1168 = vmatprep.subr.bf16.mxu1 %v1272_v0 }
 0xdd9   :  { %1169 = vmatpush3.bf16.msra.mxu1 %v1324_v4 }
 0xdda   :  { %1180 = vmatprep.subr.bf16.mxu1 %v1272_v0 }
 0xe34   :  { %v719_v26 = vpop.f32.mrb[20].mxu0 }
 0xe35   :  { %v1164_v27 = vpop.f32.mrb[21].mxu0 }
 0xe36   :  { %v722_v28 = vpop.f32.mrb[22].mxu0 }
 0xe37   :  { %v1165_v29 = vpop.f32.mrb[23].mxu0 }
 0xea7   :  { %v674_v30 = vpop.f32.mrb[20].mxu1 }
 0xea8   :  { %v720_v31 = vadd.f32 %v719_v26, %v674_v30  ;;  %v1158_v32 = vpop.f32.mrb[21].mxu1 }
 0xea9   :  { %v677_v33 = vpop.f32.mrb[22].mxu1 }
 0xeaa   :  { %v725_v34 = vadd.f32 %v1355_v12, %v720_v31  ;;  %v1159_v35 = vpop.f32.mrb[23].mxu1  ;;  %v1041_v33 = vld [vmem:[%s1496_s2 + $0x1] ss:$0 sm:$0xff] }
 0xeac   :  { %1248 = vtanh.f32 %v725_v34  ;;  %v1034_v37 = vmul.f32 -1.442695, %v725_v34 }
 0xeae   :  { %1250 = vpow2.f32 %v1034_v37 }
 0xeb6   :  { %v1249_v36 = vpop.eup %1248 }
 0xeb7   :  { %735 = vrot.lane.b32.xlu0 %v1249_v36, %s1274_s22 }
 0xeb8   :  { %v1251_v38 = vpop.eup %1250 }
 0xeb9   :  { %v729_v39 = vadd.f32 1.0, %v1251_v38 }
 0xebb   :  { %1252 = vrcp.f32 %v729_v39 }
 0xec5   :  { %v1253_v40 = vpop.eup %1252 }
 0xec6   :  { %v733_v43 = vmul.f32 %v1253_v40, %v626_v19 }
 0xf29   :  { %v736_v41 = vpop.permute.xlu0 %735 }
 0xf2a   :  { %v738_v42 = vmul.f32 %v1253_v40, %v736_v41 }
 0xf2c   :  { %740 = vrot.lane.b32.xlu1 %v738_v42, %s1275_s25 }
 0xf9e   :  { %v741_v44 = vpop.permute.xlu1 %740 }
 0xf9f   :  { %v743_v45 = vadd.f32 %v741_v44, %v733_v43 }
 0xfa1   :  { %1254 = vtanh.f32 %v743_v45 }
 0xfab   :  { %v1255_v46 = vpop.eup %1254 }
 0xfac   :  { %746 = vrot.lane.b32.xlu0 %v1255_v46, %s1274_s22 }
 0xfb0   :  { %797 = vrot.lane.b32.xlu0 %v1331_v6, %s1281_s4 }
0x101e   :  { %v747_v47 = vpop.permute.xlu0 %746 }
0x101f   :  { %v749_v48 = vmul.f32 %v1253_v40, %v747_v47 }
0x1021   :  { %v750_v49 = vpack.c.bf16 %v749_v48, %v749_v48 }
0x1022   :  { %v798_v50 = vpop.permute.xlu0 %797 }
0x1023   :  { %752 = vrot.lane.b32.xlu1 %v750_v49, %s1275_s25  ;;  %1177 = vmatmul.mubr.msk.bf16.vlgmr.msra.gmra.mrb[24].mxu0 %vm83_vm2, %v798_v50 }
0x1024   :  { %1189 = vmatpush3.bf16.msra.mxu0 %v1319_v3  ;;  %1190 = vmatprep.mubr.msk.bf16.mxu0 %vm1273_vm1, %v1272_v0 }
0x1095   :  { %v753_v51 = vpop.permute.xlu1 %752 }
0x1096   :  { %1171 = vmatmul.mubr.msk.bf16.vlgmr.msra.gmra.mrb[24].mxu1 %vm39_vm3, %v753_v51 }
0x1097   :  { %1181 = vmatpush3.bf16.msra.mxu1 %v1308_v1  ;;  %1184 = vmatprep.mubr.msk.bf16.mxu1 %vm1273_vm1, %v1272_v0 }
0x1098   :  { %1182 = vmatprep.subr.bf16.mxu1 %v1272_v0 }
0x109b   :  { %1183 = vmatpush3.bf16.msra.mxu1 %v1324_v4 }
0x10f6   :  { %v836_v52 = vpop.f32.mrb[24].mxu0 }
0x10f7   :  { %v1178_v53 = vpop.f32.mrb[25].mxu0 }
0x10f8   :  { %v839_v54 = vpop.f32.mrb[26].mxu0 }
0x10f9   :  { %v1179_v55 = vpop.f32.mrb[27].mxu0 }
0x1169   :  { %v791_v3 = vpop.f32.mrb[24].mxu1 }
0x116a   :  { %v837_v56 = vadd.f32 %v836_v52, %v791_v3  ;;  %v1172_v57 = vpop.f32.mrb[25].mxu1 }
0x116b   :  { %v794_v58 = vpop.f32.mrb[26].mxu1 }
0x116c   :  { %v842_v59 = vadd.f32 %v1355_v12, %v837_v56  ;;  %v1173_v60 = vpop.f32.mrb[27].mxu1 }
0x116e   :  { %1256 = vtanh.f32 %v842_v59  ;;  %v1037_v61 = vmul.f32 -1.442695, %v842_v59 }
0x1170   :  { %1258 = vpow2.f32 %v1037_v61 }
0x1178   :  { %v1257_v1 = vpop.eup %1256 }
0x1179   :  { %852 = vrot.lane.b32.xlu1 %v1257_v1, %s1274_s22 }
0x117a   :  { %v1259_v62 = vpop.eup %1258 }
0x117b   :  { %v846_v63 = vadd.f32 1.0, %v1259_v62 }
0x117d   :  { %1260 = vrcp.f32 %v846_v63 }
0x1187   :  { %v1261_v4 = vpop.eup %1260 }
0x1188   :  { %v850_v7 = vmul.f32 %v1261_v4, %v743_v45 }
0x11eb   :  { %v853_v2 = vpop.permute.xlu1 %852 }
0x11ec   :  { %v855_v5 = vmul.f32 %v1261_v4, %v853_v2 }
0x11ee   :  { %857 = vrot.lane.b32.xlu0 %v855_v5, %s1275_s25 }
0x1260   :  { %v858_v8 = vpop.permute.xlu0 %857 }
0x1261   :  { %v860_v9 = vadd.f32 %v858_v8, %v850_v7 }
0x1263   :  { %1262 = vtanh.f32 %v860_v9 }
0x126d   :  { %v1263_v10 = vpop.eup %1262 }
0x126e   :  { %863 = vrot.lane.b32.xlu1 %v1263_v10, %s1274_s22 }
0x1272   :  { %914 = vrot.lane.b32.xlu1 %v1331_v6, %s1282_s5 }
0x12e0   :  { %v864_v11 = vpop.permute.xlu1 %863 }
0x12e1   :  { %v866_v13 = vmul.f32 %v1261_v4, %v864_v11 }
0x12e3   :  { %v867_v14 = vpack.c.bf16 %v866_v13, %v866_v13 }
0x12e4   :  { %v915_v15 = vpop.permute.xlu1 %914 }
0x12e5   :  { %869 = vrot.lane.b32.xlu0 %v867_v14, %s1275_s25  ;;  %1191 = vmatmul.mubr.msk.bf16.vlgmr.msra.gmra.mrb[28].mxu0 %vm83_vm2, %v915_v15 }
0x1357   :  { %v870_v16 = vpop.permute.xlu0 %869 }
0x1358   :  { %1185 = vmatmul.mubr.msk.bf16.vlgmr.msra.gmra.mrb[28].mxu1 %vm39_vm3, %v870_v16 }
0x13b8   :  { %v953_v17 = vpop.f32.mrb[28].mxu0 }
0x13b9   :  { %v1192_v18 = vpop.f32.mrb[29].mxu0 }
0x13ba   :  { %v956_v19 = vpop.f32.mrb[30].mxu0 }
0x13bb   :  { %v1193_v20 = vpop.f32.mrb[31].mxu0 }
0x142b   :  { %v908_v21 = vpop.f32.mrb[28].mxu1 }
0x142c   :  { %v954_v22 = vadd.f32 %v953_v17, %v908_v21  ;;  %v1186_v23 = vpop.f32.mrb[29].mxu1 }
0x142d   :  { %v911_v24 = vpop.f32.mrb[30].mxu1 }
0x142e   :  { %v959_v6 = vadd.f32 %v1355_v12, %v954_v22  ;;  %v1187_v25 = vpop.f32.mrb[31].mxu1 }
0x1430   :  { %1264 = vtanh.f32 %v959_v6  ;;  %v1040_v27 = vmul.f32 -1.442695, %v959_v6 }
0x1432   :  { %1266 = vpow2.f32 %v1040_v27 }
0x143a   :  { %v1265_v26 = vpop.eup %1264 }
0x143b   :  { %969 = vrot.lane.b32.xlu0 %v1265_v26, %s1274_s22 }
0x143c   :  { %v1267_v28 = vpop.eup %1266 }
0x143d   :  { %v963_v29 = vadd.f32 1.0, %v1267_v28 }
0x143f   :  { %1268 = vrcp.f32 %v963_v29 }
0x1449   :  { %v1269_v30 = vpop.eup %1268 }
0x144a   :  { %v967_v12 = vmul.f32 %v1269_v30, %v860_v9 }
0x14ad   :  { %v970_v31 = vpop.permute.xlu0 %969 }
0x14ae   :  { %v972_v32 = vmul.f32 %v1269_v30, %v970_v31 }
0x14b0   :  { %974 = vrot.lane.b32.xlu1 %v972_v32, %s1275_s25 }
0x14b4   :  { %989 = vrot.lane.b32.xlu1 %v1041_v33, %s1283_s8 }
0x1522   :  { %v975_v34 = vpop.permute.xlu1 %974 }
0x1523   :  { %v977_v35 = vadd.f32 %v975_v34, %v967_v12 }
0x1525   :  { %1270 = vtanh.f32 %v977_v35 }
0x1526   :  { %v990_v38 = vpop.permute.xlu1 %989 }
0x152f   :  { %v1271_v36 = vpop.eup %1270 }
0x1530   :  { %980 = vrot.lane.b32.xlu0 %v1271_v36, %s1274_s22 }
0x15a2   :  { %v981_v37 = vpop.permute.xlu0 %980 }
0x15a3   :  { %v983_v39 = vmul.f32 %v1269_v30, %v981_v37 }
0x15a5   :  { %v992_v40 = vmul.f32 %v990_v38, %v983_v39 }
0x15a7   :  { %994 = vrot.lane.b32.xlu0 %v992_v40, %s1275_s25 }
0x15ab   :  { %1004 = vrot.lane.b32.xlu0 %v983_v39, %s1275_s25 }
0x1619   :  { %v995_v41 = vpop.permute.xlu0 %994 }
0x161a   :  { %v998_v42 = vsel %vm997_vm4, %v995_v41, 0.0 }
0x161b   :  { %999 = vadd.xlane.f32.xlu1 %v998_v42 }
0x161d   :  { %v1005_v43 = vpop.permute.xlu0 %1004 }
0x161e   :  { %1007 = vst.msk [vmem:[%s1497_s3] sm:$0x3] %vm997_vm4, %v1005_v43 }
0x16a8   :  { %v1000_v44 = vpop.xlane.xlu1 %999 }
0x16a9   :  { %v1001_v0 = vadd.f32 %v1041_v33, %v1000_v44 }
0x16ab   :  { %1009 = vst.msk [vmem:[%s1497_s3] sm:$0x3] %vm1008_vm5, %v1001_v0 }

</bundles_post_ra>
